<compile_context>
chip_gen: v7x
topology: tpu7x:2x2x1
jax: 0.10.0
libtpu: 0.0.40
codegen_flags: <defaults>
</compile_context>

<pallas_src>
import jax
import jax.numpy as jnp
from jax.experimental import pallas as pl
from jax.experimental.pallas import tpu as pltpu


def _round_up(a, m):
    return ((a + m - 1) // m) * m


def mlp_kernel(x_ref, w1_ref, b1_ref, w2_ref, b2_ref, w3_ref, b3_ref, o_ref):
    # Layer 1: Linear(32 -> H1) + ReLU   (bf16 MXU matmul, f32 accumulate)
    h = jnp.dot(x_ref[...], w1_ref[...], preferred_element_type=jnp.float32) + b1_ref[...]
    h = jnp.maximum(h, 0.0)
    # Layer 2: Linear(H1 -> H2) + ReLU
    h = jnp.dot(h.astype(w2_ref.dtype), w2_ref[...],
                preferred_element_type=jnp.float32) + b2_ref[...]
    h = jnp.maximum(h, 0.0)
    # Output head: Linear(H2 -> 1).  An N=1 MXU matmul would use 1/128-1/256 of the
    # systolic array, so do it on the VPU (mul) + XLU lane reduction instead.
    out_row = jnp.sum(h * w3_ref[...], axis=-1)                 # (block_m,)
    # Lane-dense store: batch lies along the 128-lane axis of the (1, block_m) tile.
    o_ref[...] = (out_row[None, :] + b3_ref[...]).astype(o_ref.dtype)


def mlp_forward(x, params, *, max_block_m=512, use_bf16=True):
    """x: (B, 32) float32. params: ((w1,b1),(w2,b2),(w3,b3)) with w_i stored as (in, out).

    Returns (B, 1) float32, matching MyModel.forward.
    """
    (w1, b1), (w2, b2), (w3, b3) = params
    B, Din = x.shape
    H1 = w1.shape[1]
    H2 = w2.shape[1]

    # Pick one large, lane-aligned batch tile; pad the batch instead of asserting.
    block_m = min(max_block_m, _round_up(B, 128))
    B_pad = _round_up(B, block_m)
    num_blocks = B_pad // block_m

    if B_pad != B:
        x = jnp.pad(x, ((0, B_pad - B), (0, 0)))

    mm_dtype = jnp.bfloat16 if use_bf16 else jnp.float32
    x_mm = x.astype(mm_dtype)
    w1_mm = w1.astype(mm_dtype)
    w2_mm = w2.astype(mm_dtype)

    # Biases kept 2D so they broadcast over rows; w3 as a (1, H2) row for the VPU head.
    b1 = b1.reshape(1, H1).astype(jnp.float32)
    b2 = b2.reshape(1, H2).astype(jnp.float32)
    w3_row = w3.reshape(1, H2).astype(jnp.float32)
    b3 = b3.reshape(1, 1).astype(jnp.float32)

    grid = (num_blocks,)

    out_t = pl.pallas_call(
        mlp_kernel,
        out_shape=jax.ShapeDtypeStruct((1, B_pad), jnp.float32),
        grid_spec=pltpu.PrefetchScalarGridSpec(
            num_scalar_prefetch=0,
            grid=grid,
            in_specs=[
                pl.BlockSpec((block_m, Din), lambda i: (i, 0)),   # x tile over batch
                pl.BlockSpec((Din, H1), lambda i: (0, 0)),        # w1 (resident)
                pl.BlockSpec((1, H1), lambda i: (0, 0)),          # b1
                pl.BlockSpec((H1, H2), lambda i: (0, 0)),         # w2
                pl.BlockSpec((1, H2), lambda i: (0, 0)),          # b2
                pl.BlockSpec((1, H2), lambda i: (0, 0)),          # w3 as a row
                pl.BlockSpec((1, 1), lambda i: (0, 0)),           # b3
            ],
            # Lane-dense output: (1, B_pad), tiled along the lane axis per grid step.
            out_specs=pl.BlockSpec((1, block_m), lambda i: (0, i)),
        ),
        compiler_params=pltpu.CompilerParams(
            dimension_semantics=("parallel",),
        ),
    )(x_mm, w1_mm, b1, w2_mm, b2, w3_row, b3)

    # Back to the module's (B, 1) layout (drop batch padding).
    return out_t[0, :B].reshape(B, 1)


def init_params(key, layer_sizes, in_features=32):
    """Deterministic init mimicking nn.Linear's U(-1/sqrt(fan_in), 1/sqrt(fan_in)).
    Weights returned pre-transposed to (in, out)."""
    params = []
    dims = [in_features] + list(layer_sizes) + [1]
    for i in range(len(dims) - 1):
        fan_in, fan_out = dims[i], dims[i + 1]
        key, kw, kb = jax.random.split(key, 3)
        bound = 1.0 / jnp.sqrt(fan_in)
        w = jax.random.uniform(kw, (fan_in, fan_out), jnp.float32, -bound, bound)
        b = jax.random.uniform(kb, (fan_out,), jnp.float32, -bound, bound)
        params.append((w, b))
    return tuple(params)


def reference_forward(x, params):
    (w1, b1), (w2, b2), (w3, b3) = params
    h = jnp.maximum(x @ w1 + b1, 0.0)
    h = jnp.maximum(h @ w2 + b2, 0.0)
    return h @ w3 + b3


if __name__ == "__main__":
    key = jax.random.PRNGKey(0)
    key, kx = jax.random.split(key)

    # MyModel(n_layers=2, layer_sizes=[64, 32]); input features fixed at 32.
    layer_sizes = [64, 32]
    batch = 16

    x = jax.random.normal(kx, (batch, 32), dtype=jnp.float32)
    params = init_params(key, layer_sizes, in_features=32)

    out = mlp_forward(x, params)
    out = jax.block_until_ready(out)

    ref = reference_forward(x, params)
    assert out.shape == (batch, 1)
    # bf16 matmul inputs (f32 accumulation) -> tolerate ~1e-2-level deviation from f32 ref.
    assert jnp.allclose(out, ref, atol=5e-2, rtol=5e-2)

    print("KERNEL_OK")
</pallas_src>

<mosaic_0001>
module attributes {stable_mosaic.version = 11 : i64} {
  func.func @mlp_kernel(%arg0: i32, %arg1: memref<128x32xbf16, #tpu.memory_space<vmem>>, %arg2: memref<32x64xbf16, #tpu.memory_space<vmem>>, %arg3: memref<1x64xf32, #tpu.memory_space<vmem>>, %arg4: memref<64x32xbf16, #tpu.memory_space<vmem>>, %arg5: memref<1x32xf32, #tpu.memory_space<vmem>>, %arg6: memref<1x32xf32, #tpu.memory_space<vmem>>, %arg7: memref<1x1xf32, #tpu.memory_space<vmem>>, %arg8: memref<1x128xf32, #tpu.memory_space<vmem>>) attributes {dimension_semantics = [#tpu.dimension_semantics<parallel>], iteration_bounds = array<i64: 1>, scalar_prefetch = 0 : i64, scratch_operands = 0 : i64, tpu.core_type = #tpu.core_type<tc>, window_params = [{transform_indices = @transform_0, window_bounds = array<i64: 128, 32>}, {pipeline_mode = #tpu.pipeline_mode<synchronous>, transform_indices = @transform_1, window_bounds = array<i64: 32, 64>}, {pipeline_mode = #tpu.pipeline_mode<synchronous>, transform_indices = @transform_2, window_bounds = array<i64: 1, 64>}, {pipeline_mode = #tpu.pipeline_mode<synchronous>, transform_indices = @transform_3, window_bounds = array<i64: 64, 32>}, {pipeline_mode = #tpu.pipeline_mode<synchronous>, transform_indices = @transform_4, window_bounds = array<i64: 1, 32>}, {pipeline_mode = #tpu.pipeline_mode<synchronous>, transform_indices = @transform_5, window_bounds = array<i64: 1, 32>}, {pipeline_mode = #tpu.pipeline_mode<synchronous>, transform_indices = @transform_6, window_bounds = array<i64: 1, 1>}, {transform_indices = @transform_7, window_bounds = array<i64: 1, 128>}]} {
    %c0 = arith.constant 0 : index
    %c0_0 = arith.constant 0 : index
    %0 = vector.load %arg1[%c0, %c0_0] : memref<128x32xbf16, #tpu.memory_space<vmem>>, vector<128x32xbf16>
    %c0_1 = arith.constant 0 : index
    %c0_2 = arith.constant 0 : index
    %1 = vector.load %arg2[%c0_1, %c0_2] : memref<32x64xbf16, #tpu.memory_space<vmem>>, vector<32x64xbf16>
    %cst = arith.constant dense<0.000000e+00> : vector<128x64xf32>
    %2 = tpu.matmul %0, %1, %cst {dimension_numbers = #tpu.dot_dimension_numbers<[1], [0], [0], [1], [0, 0, 1, 1], [], []>} : vector<128x32xbf16>, vector<32x64xbf16>, vector<128x64xf32> -> vector<128x64xf32>
    %c0_3 = arith.constant 0 : index
    %c0_4 = arith.constant 0 : index
    %3 = vector.load %arg3[%c0_3, %c0_4] : memref<1x64xf32, #tpu.memory_space<vmem>>, vector<1x64xf32>
    %4 = vector.broadcast %3 : vector<1x64xf32> to vector<128x64xf32>
    %5 = arith.addf %2, %4 : vector<128x64xf32>
    %cst_5 = arith.constant 0.000000e+00 : f32
    %6 = vector.broadcast %cst_5 : f32 to vector<128x64xf32>
    %7 = arith.maximumf %5, %6 : vector<128x64xf32>
    %8 = arith.truncf %7 : vector<128x64xf32> to vector<128x64xbf16>
    %c0_6 = arith.constant 0 : index
    %c0_7 = arith.constant 0 : index
    %9 = vector.load %arg4[%c0_6, %c0_7] : memref<64x32xbf16, #tpu.memory_space<vmem>>, vector<64x32xbf16>
    %cst_8 = arith.constant dense<0.000000e+00> : vector<128x32xf32>
    %10 = tpu.matmul %8, %9, %cst_8 {dimension_numbers = #tpu.dot_dimension_numbers<[1], [0], [0], [1], [0, 0, 1, 1], [], []>} : vector<128x64xbf16>, vector<64x32xbf16>, vector<128x32xf32> -> vector<128x32xf32>
    %c0_9 = arith.constant 0 : index
    %c0_10 = arith.constant 0 : index
    %11 = vector.load %arg5[%c0_9, %c0_10] : memref<1x32xf32, #tpu.memory_space<vmem>>, vector<1x32xf32>
    %12 = vector.broadcast %11 : vector<1x32xf32> to vector<128x32xf32>
    %13 = arith.addf %10, %12 : vector<128x32xf32>
    %cst_11 = arith.constant 0.000000e+00 : f32
    %14 = vector.broadcast %cst_11 : f32 to vector<128x32xf32>
    %15 = arith.maximumf %13, %14 : vector<128x32xf32>
    %c0_12 = arith.constant 0 : index
    %c0_13 = arith.constant 0 : index
    %16 = vector.load %arg6[%c0_12, %c0_13] : memref<1x32xf32, #tpu.memory_space<vmem>>, vector<1x32xf32>
    %17 = vector.broadcast %16 : vector<1x32xf32> to vector<128x32xf32>
    %18 = arith.mulf %15, %17 : vector<128x32xf32>
    %cst_14 = arith.constant dense<0.000000e+00> : vector<128xf32>
    %19 = vector.multi_reduction <add>, %18, %cst_14 [1] : vector<128x32xf32> to vector<128xf32>
    %20 = vector.shape_cast %19 : vector<128xf32> to vector<1x128xf32>
    %c0_15 = arith.constant 0 : index
    %c0_16 = arith.constant 0 : index
    %21 = vector.load %arg7[%c0_15, %c0_16] : memref<1x1xf32, #tpu.memory_space<vmem>>, vector<1x1xf32>
    %22 = vector.broadcast %21 : vector<1x1xf32> to vector<1x128xf32>
    %23 = arith.addf %20, %22 : vector<1x128xf32>
    %c0_17 = arith.constant 0 : index
    %c0_18 = arith.constant 0 : index
    %24 = vector.load %arg8[%c0_17, %c0_18] : memref<1x128xf32, #tpu.memory_space<vmem>>, vector<1x128xf32>
    tpu.vector_store %arg8[%c0_17, %c0_18], %23 {strides = array<i32>} : memref<1x128xf32, #tpu.memory_space<vmem>>, vector<1x128xf32>,
    return
  }
  func.func @transform_0(%arg0: i32) -> (i32, i32) {
    %c0_i32 = arith.constant 0 : i32
    %c0_i32_0 = arith.constant 0 : i32
    return %arg0, %c0_i32 : i32, i32
  }
  func.func @transform_1(%arg0: i32) -> (i32, i32) {
    %c0_i32 = arith.constant 0 : i32
    %c0_i32_0 = arith.constant 0 : i32
    %c0_i32_1 = arith.constant 0 : i32
    return %c0_i32, %c0_i32_0 : i32, i32
  }
  func.func @transform_2(%arg0: i32) -> (i32, i32) {
    %c0_i32 = arith.constant 0 : i32
    %c0_i32_0 = arith.constant 0 : i32
    %c0_i32_1 = arith.constant 0 : i32
    return %c0_i32, %c0_i32_0 : i32, i32
  }
  func.func @transform_3(%arg0: i32) -> (i32, i32) {
    %c0_i32 = arith.constant 0 : i32
    %c0_i32_0 = arith.constant 0 : i32
    %c0_i32_1 = arith.constant 0 : i32
    return %c0_i32, %c0_i32_0 : i32, i32
  }
  func.func @transform_4(%arg0: i32) -> (i32, i32) {
    %c0_i32 = arith.constant 0 : i32
    %c0_i32_0 = arith.constant 0 : i32
    %c0_i32_1 = arith.constant 0 : i32
    return %c0_i32, %c0_i32_0 : i32, i32
  }
  func.func @transform_5(%arg0: i32) -> (i32, i32) {
    %c0_i32 = arith.constant 0 : i32
    %c0_i32_0 = arith.constant 0 : i32
    %c0_i32_1 = arith.constant 0 : i32
    return %c0_i32, %c0_i32_0 : i32, i32
  }
  func.func @transform_6(%arg0: i32) -> (i32, i32) {
    %c0_i32 = arith.constant 0 : i32
    %c0_i32_0 = arith.constant 0 : i32
    %c0_i32_1 = arith.constant 0 : i32
    return %c0_i32, %c0_i32_0 : i32, i32
  }
  func.func @transform_7(%arg0: i32) -> (i32, i32) {
    %c0_i32 = arith.constant 0 : i32
    %c0_i32_0 = arith.constant 0 : i32
    return %c0_i32, %arg0 : i32, i32
  }
}

</mosaic_0001>

<bundles_post_ra>
// kernel: tpu_custom_call.1
= control target key start
LH: loop header
LB: loop body
LE: loop exit
PB: predicated region body
PF: predicated region fallthrough
CT: control target
= control target key end

     0   :  { %s1047_s0 = inlined_call_operand.vmem [shape: bf16[128,32], index: 0, kind: input, shape index: {}]   ;;  %s1048_s1 = inlined_call_operand.vmem [shape: bf16[32,64], index: 1, kind: input, shape index: {}]   ;;  %s1049_s2 = inlined_call_operand.vmem [shape: f32[1,64], index: 2, kind: input, shape index: {}]   ;;  %s1050_s3 = inlined_call_operand.vmem [shape: bf16[64,32], index: 3, kind: input, shape index: {}]   ;;  %s1051_s4 = inlined_call_operand.vmem [shape: f32[1,32], index: 4, kind: input, shape index: {}]   ;;  %s1052_s5 = inlined_call_operand.vmem [shape: f32[1,32], index: 5, kind: input, shape index: {}]   ;;  %s1053_s6 = inlined_call_operand.<no memory space> [shape: f32[1,1], index: 6, kind: input, shape index: {}]   ;;  %s1054_s7 = inlined_call_operand.hbm [shape: f32[1,128], index: 7, kind: output, shape index: {}]  }
   0x1   :  { %v12_v0 = vstv %s1053_s6 }
   0x2   :  { %13 = vst [vmem:[#allocation2] sm:$0x1] %v12_v0 }
   0x3   :  { %v775_v1 = vld [vmem:[%s1048_s1] sm:$0xff]   ;;  %v776_v2 = vld [vmem:[%s1048_s1 + $0x8] sm:$0xff]   ;;  %vm109_vm0 = vcmask 261120   ;;  %v779_v5 = vld [vmem:[%s1047_s0 + $0x10] sm:$0xff]  }
   0x4   :  { %727 = vmatprep.subr.bf16.mxu0 %v775_v1  ;;  %v777_v3 = vld [vmem:[%s1047_s0] sm:$0xff]   ;;  %v778_v4 = vld [vmem:[%s1047_s0 + $0x8] sm:$0xff]  }
   0x5   :  { %728 = vmatpush3.bf16.msra.mxu0 %v775_v1  ;;  %731 = vmatprep.mubr.msk.bf16.mxu0 %vm109_vm0, %v777_v3  ;;  %v785_v6 = vld [vmem:[%s1050_s3] sm:$0xff]   ;;  %v786_v7 = vld [vmem:[%s1050_s3 + $0x8] sm:$0xff]  }
   0x6   :  { %729 = vmatprep.subr.bf16.mxu0 %v776_v2  ;;  %747 = vmatprep.subr.bf16.mxu1 %v785_v6 }
   0x7   :  { %748 = vmatpush3.bf16.msra.mxu1 %v785_v6 }
   0x9   :  { %730 = vmatpush3.bf16.msra.mxu0 %v776_v2 }
   0xc   :  { %732 = vmatmul.mubr.msk.bf16.vlgmr.msra.gmra.mrb[0].mxu0 %vm109_vm0, %v778_v4 }
   0xd   :  { %735 = vmatprep.mubr.msk.bf16.mxu0 %vm109_vm0, %v779_v5 }
   0xe   :  { %14 = vsyncpa [#allocation4], 0  ;;  %v780_v8 = vld [vmem:[%s1047_s0 + $0x18] sm:$0xff]   ;;  %749 = vmatprep.subr.bf16.mxu1 %v786_v7  ;;  %v781_v9 = vld [vmem:[%s1047_s0 + $0x20] sm:$0xff]   ;;  %vm294_vm1 = vcmask 523264   ;;  %vm556_vm2 = vcmask 130112  }
   0xf   :  { %750 = vmatpush3.bf16.msra.mxu1 %v786_v7  ;;  %v782_v10 = vld [vmem:[%s1047_s0 + $0x28] sm:$0xff]   ;;  %v783_v11 = vld [vmem:[%s1047_s0 + $0x30] sm:$0xff]   ;;  %v784_v12 = vld [vmem:[%s1047_s0 + $0x38] sm:$0xff]   ;;  %vm563_vm3 = vcmask 195712   ;;  %vm570_vm4 = vcmask 261312   ;;  %vm577_vm5 = vcmask 326912  }
  0x10   :  { %v787_v13 = vld [vmem:[%s1050_s3 + $0x10] sm:$0xff]   ;;  %v788_v14 = vld [vmem:[%s1050_s3 + $0x18] sm:$0xff]   ;;  %v672_v15 = vld [vmem:[%s1049_s2] ss:$0 sm:$0xff]  ;;  %vm584_vm6 = vcmask 392512   ;;  %vm591_vm7 = vcmask 458112  }
  0x11   :  { %751 = vmatprep.subr.bf16.mxu1 %v787_v13  ;;  %vm598_vm8 = vcmask 523712   ;;  %vm605_vm9 = vcmask 589312   ;;  %vm612_vm10 = vcmask 654912   ;;  %vm619_vm11 = vcmask 720512  }
  0x12   :  { %vm626_vm12 = vcmask 786112   ;;  %vm633_vm13 = vcmask 851712   ;;  %vm640_vm14 = vcmask 917312   ;;  %vm647_vm15 = vcmask 982912  }
  0x13   :  { %752 = vmatpush3.bf16.msra.mxu1 %v787_v13 }
  0x14   :  { %736 = vmatmul.mubr.msk.bf16.gmra.mrb[4].mxu0 %vm109_vm0, %v780_v8  ;;  %753 = vmatprep.subr.bf16.mxu1 %v788_v14  ;;  %v813_v8 = vmov 0  }
  0x15   :  { %739 = vmatprep.mubr.msk.bf16.mxu0 %vm109_vm0, %v781_v9  ;;  %773 = vset.pattern.permute.xlu1 %v813_v8  ;;  %v922_v9 = vld [vmem:[%s1051_s4] ss:$0 sm:$0xff]  ;;  %s814_s4 = smov [#allocation3]  }
  0x16   :  { %774 = vset.pattern.permute.xlu0 %v813_v8 }
  0x17   :  { %754 = vmatpush3.bf16.msra.mxu1 %v788_v14 }
  0x1c   :  { %740 = vmatmul.mubr.msk.bf16.gmra.mrb[8].mxu0 %vm109_vm0, %v782_v10 }
  0x1d   :  { %743 = vmatprep.mubr.msk.bf16.mxu0 %vm109_vm0, %v783_v11 }
  0x24   :  { %744 = vmatmul.mubr.msk.bf16.gmra.mrb[12].mxu0 %vm109_vm0, %v784_v12 }
  0xdf   :  { %v733_v16 = vpop.f32.mrb[0].mxu0 }
  0xe0   :  { %v177_v17 = vadd.f32 %v733_v16, %v672_v15  ;;  %v168_v18 = vpop.f32.mrb[1].mxu0 }
  0xe1   :  { %v169_v19 = vadd.f32 %v672_v15, %v168_v18  ;;  %v734_v20 = vpop.f32.mrb[2].mxu0 }
  0xe2   :  { %v180_v21 = vadd.f32 %v734_v20, %v672_v15  ;;  %v171_v22 = vpop.f32.mrb[3].mxu0  ;;  %v233_v24 = vmax.f32 %v177_v17, 0.0 }
  0xe3   :  { %v172_v23 = vadd.f32 %v672_v15, %v171_v22  ;;  %v231_v26 = vmax.f32 %v169_v19, 0.0 }
  0xe4   :  { %v234_v25 = vmax.f32 %v180_v21, 0.0 }
  0xe5   :  { %v232_v27 = vmax.f32 %v172_v23, 0.0 }
  0xe6   :  { %v248_v28 = vpack.c.bf16 %v234_v25, %v233_v24 }
  0xe7   :  { %v737_v29 = vpop.f32.mrb[4].mxu0  ;;  %v247_v30 = vpack.c.bf16 %v232_v27, %v231_v26 }
  0xe8   :  { %v193_v31 = vadd.f32 %v737_v29, %v672_v15  ;;  %v184_v32 = vpop.f32.mrb[5].mxu0 }
  0xe9   :  { %v185_v33 = vadd.f32 %v672_v15, %v184_v32  ;;  %v738_v34 = vpop.f32.mrb[6].mxu0  ;;  %755 = vmatprep.mubr.msk.bf16.mxu1 %vm294_vm1, %v247_v30 }
  0xea   :  { %v196_v35 = vadd.f32 %v738_v34, %v672_v15  ;;  %v187_v36 = vpop.f32.mrb[7].mxu0  ;;  %756 = vmatmul.mubr.msk.bf16.vlgmr.msra.gmra.mrb[0].mxu1 %vm294_vm1, %v248_v28  ;;  %v237_v38 = vmax.f32 %v193_v31, 0.0 }
  0xeb   :  { %v188_v37 = vadd.f32 %v672_v15, %v187_v36  ;;  %v235_v40 = vmax.f32 %v185_v33, 0.0 }
  0xec   :  { %v238_v39 = vmax.f32 %v196_v35, 0.0 }
  0xed   :  { %v236_v41 = vmax.f32 %v188_v37, 0.0 }
  0xee   :  { %v250_v42 = vpack.c.bf16 %v238_v39, %v237_v38 }
  0xef   :  { %v249_v43 = vpack.c.bf16 %v236_v41, %v235_v40  ;;  %v741_v44 = vpop.f32.mrb[8].mxu0 }
  0xf0   :  { %v209_v45 = vadd.f32 %v741_v44, %v672_v15  ;;  %v200_v46 = vpop.f32.mrb[9].mxu0 }
  0xf1   :  { %759 = vmatprep.mubr.msk.bf16.mxu1 %vm294_vm1, %v249_v43  ;;  %v201_v47 = vadd.f32 %v672_v15, %v200_v46  ;;  %v742_v48 = vpop.f32.mrb[10].mxu0 }
  0xf2   :  { %760 = vmatmul.mubr.msk.bf16.gmra.mrb[4].mxu1 %vm294_vm1, %v250_v42  ;;  %v241_v49 = vmax.f32 %v209_v45, 0.0  ;;  %v212_v50 = vadd.f32 %v742_v48, %v672_v15  ;;  %v203_v51 = vpop.f32.mrb[11].mxu0 }
  0xf3   :  { %v239_v52 = vmax.f32 %v201_v47, 0.0  ;;  %v204_v53 = vadd.f32 %v672_v15, %v203_v51 }
  0xf4   :  { %v242_v54 = vmax.f32 %v212_v50, 0.0 }
  0xf5   :  { %v240_v55 = vmax.f32 %v204_v53, 0.0 }
  0xf6   :  { %v252_v56 = vpack.c.bf16 %v242_v54, %v241_v49 }
  0xf7   :  { %v251_v57 = vpack.c.bf16 %v240_v55, %v239_v52  ;;  %v745_v58 = vpop.f32.mrb[12].mxu0 }
  0xf8   :  { %v225_v59 = vadd.f32 %v745_v58, %v672_v15  ;;  %v216_v60 = vpop.f32.mrb[13].mxu0 }
  0xf9   :  { %763 = vmatprep.mubr.msk.bf16.mxu1 %vm294_vm1, %v251_v57  ;;  %v217_v61 = vadd.f32 %v672_v15, %v216_v60  ;;  %v746_v62 = vpop.f32.mrb[14].mxu0 }
  0xfa   :  { %764 = vmatmul.mubr.msk.bf16.gmra.mrb[8].mxu1 %vm294_vm1, %v252_v56  ;;  %v245_v63 = vmax.f32 %v225_v59, 0.0  ;;  %v228_v0 = vadd.f32 %v746_v62, %v672_v15  ;;  %v219_v1 = vpop.f32.mrb[15].mxu0 }
  0xfb   :  { %v243_v2 = vmax.f32 %v217_v61, 0.0  ;;  %v220_v3 = vadd.f32 %v672_v15, %v219_v1  ;;  %v929_v15 = vld [vmem:[%s1052_s5] ss:$0 sm:$0xff]  ;;  %s664_s5 = sshll.u32 %s814_s4, 4  ;;  %s665_s5 = int_to_ptr.vmem [resolvable:$true] %s664_s5 }
  0xfc   :  { %v246_v4 = vmax.f32 %v228_v0, 0.0  ;;  %s789_s6 = scalar_lea.vmem %s665_s5, 16  ;;  %s793_s9 = scalar_lea.vmem %s665_s5, 32 }
  0xfd   :  { %v244_v5 = vmax.f32 %v220_v3, 0.0  ;;  %p790_p0 = scmp.ne.s32.totalorder %s665_s5, %s789_s6  ;;  %p794_p1 = scmp.lt.s32.totalorder %s665_s5, %s665_s5 }
  0xfe   :  { %v254_v6 = vpack.c.bf16 %v246_v4, %v245_v63  ;;  %p795_p2 = scmp.lt.s32.totalorder %s793_s9, %s789_s6 }
  0xff   :  { %v253_v7 = vpack.c.bf16 %v244_v5, %v243_v2 }
 0x100   :  { %p796_p3 = por %p795_p2, %p794_p1 }
 0x101   :  { %767 = vmatprep.mubr.msk.bf16.mxu1 %vm294_vm1, %v253_v7 }
 0x102   :  { %768 = vmatmul.mubr.msk.bf16.gmra.mrb[12].mxu1 %vm294_vm1, %v254_v6  ;;  %p797_p4 = pnand %p796_p3, %p790_p0 }
 0x1bd   :  { %v757_v10 = vpop.f32.mrb[0].mxu1 }
 0x1be   :  { %v362_v11 = vadd.f32 %v757_v10, %v922_v9  ;;  %v353_v12 = vpop.f32.mrb[1].mxu1 }
 0x1bf   :  { %v354_v13 = vadd.f32 %v922_v9, %v353_v12  ;;  %v758_v14 = vpop.f32.mrb[2].mxu1 }
 0x1c0   :  { %v418_v16 = vmax.f32 %v362_v11, 0.0  ;;  %v365_v17 = vadd.f32 %v758_v14, %v922_v9  ;;  %v356_v18 = vpop.f32.mrb[3].mxu1 }
 0x1c1   :  { %v416_v19 = vmax.f32 %v354_v13, 0.0  ;;  %v357_v20 = vadd.f32 %v922_v9, %v356_v18  ;;  %v503_v13 = vld [vmem:[#allocation2] sm:$0x1] }
 0x1c2   :  { %v419_v21 = vmax.f32 %v365_v17, 0.0  ;;  %v441_v22 = vmul.f32 %v929_v15, %v418_v16 }
 0x1c3   :  { %v417_v23 = vmax.f32 %v357_v20, 0.0  ;;  %v439_v24 = vmul.f32 %v929_v15, %v416_v19 }
 0x1c4   :  { %v461_v25 = vsel %vm109_vm0, %v441_v22, 0.0  ;;  %v442_v26 = vmul.f32 %v929_v15, %v419_v21 }
 0x1c5   :  { %462 = vadd.xlane.f32.xlu1 %v461_v25  ;;  %v761_v27 = vpop.f32.mrb[4].mxu1  ;;  %v455_v28 = vsel %vm109_vm0, %v439_v24, 0.0  ;;  %v440_v29 = vmul.f32 %v929_v15, %v417_v23 }
 0x1c6   :  { %v378_v30 = vadd.f32 %v761_v27, %v922_v9  ;;  %v369_v31 = vpop.f32.mrb[5].mxu1  ;;  %456 = vadd.xlane.f32.xlu0 %v455_v28  ;;  %v464_v36 = vsel %vm109_vm0, %v442_v26, 0.0 }
 0x1c7   :  { %v370_v32 = vadd.f32 %v922_v9, %v369_v31  ;;  %v762_v33 = vpop.f32.mrb[6].mxu1  ;;  %v458_v40 = vsel %vm109_vm0, %v440_v29, 0.0 }
 0x1c8   :  { %v422_v34 = vmax.f32 %v378_v30, 0.0  ;;  %v372_v35 = vpop.f32.mrb[7].mxu1  ;;  %v381_v38 = vadd.f32 %v762_v33, %v922_v9 }
 0x1c9   :  { %v420_v37 = vmax.f32 %v370_v32, 0.0  ;;  %v373_v39 = vadd.f32 %v922_v9, %v372_v35  ;;  %465 = vadd.xlane.f32.xlu1 %v464_v36  ;;  %v509_v35 = vlaneseq }
 0x1ca   :  { %459 = vadd.xlane.f32.xlu0 %v458_v40  ;;  %v445_v41 = vmul.f32 %v929_v15, %v422_v34  ;;  %v423_v44 = vmax.f32 %v381_v38, 0.0 }
 0x1cb   :  { %v421_v42 = vmax.f32 %v373_v39, 0.0  ;;  %v443_v47 = vmul.f32 %v929_v15, %v420_v37  ;;  %v977_v38 = vshrl.u32 %v509_v35, 7  ;;  %v980_v39 = vand.u32 127, %v509_v35 }
 0x1cc   :  { %v473_v43 = vsel %vm109_vm0, %v445_v41, 0.0  ;;  %v446_v57 = vmul.f32 %v929_v15, %v423_v44 }
 0x1cd   :  { %v444_v45 = vmul.f32 %v929_v15, %v421_v42  ;;  %v765_v46 = vpop.f32.mrb[8].mxu1  ;;  %v467_v56 = vsel %vm109_vm0, %v443_v47, 0.0  ;;  %v558_v44 = vadd.s32 4294967280, %v980_v39 }
 0x1ce   :  { %474 = vadd.xlane.f32.xlu0 %v473_v43  ;;  %v394_v48 = vadd.f32 %v765_v46, %v922_v9  ;;  %v385_v49 = vpop.f32.mrb[9].mxu1  ;;  %v476_v63 = vsel %vm109_vm0, %v446_v57, 0.0  ;;  %v551_v43 = vadd.s32 4294967288, %v980_v39  ;;  %v572_v57 = vadd.s32 4294967264, %v980_v39 }
 0x1cf   :  { %v470_v50 = vsel %vm109_vm0, %v444_v45, 0.0  ;;  %v386_v51 = vadd.f32 %v922_v9, %v385_v49  ;;  %v766_v52 = vpop.f32.mrb[10].mxu1 }
 0x1d0   :  { %471 = vadd.xlane.f32.xlu1 %v470_v50  ;;  %v426_v53 = vmax.f32 %v394_v48, 0.0  ;;  %v397_v54 = vadd.f32 %v766_v52, %v922_v9  ;;  %v388_v55 = vpop.f32.mrb[11].mxu1  ;;  %v549_v48 = vsub.s32 %v980_v39, %v977_v38  ;;  %v554_v49 = vsub.s32 %v551_v43, %v977_v38 }
 0x1d1   :  { %v424_v59 = vmax.f32 %v386_v51, 0.0  ;;  %v389_v60 = vadd.f32 %v922_v9, %v388_v55  ;;  %v561_v51 = vsub.s32 %v558_v44, %v977_v38 }
 0x1d2   :  { %468 = vadd.xlane.f32.xlu0 %v467_v56  ;;  %v427_v58 = vmax.f32 %v397_v54, 0.0  ;;  %v449_v61 = vmul.f32 %v929_v15, %v426_v53  ;;  %v565_v54 = vadd.s32 4294967272, %v980_v39 }
 0x1d3   :  { %v425_v2 = vmax.f32 %v389_v60, 0.0  ;;  %v447_v5 = vmul.f32 %v929_v15, %v424_v59 }
 0x1d4   :  { %v450_v62 = vmul.f32 %v929_v15, %v427_v58  ;;  %v485_v3 = vsel %vm109_vm0, %v449_v61, 0.0  ;;  %v568_v60 = vsub.s32 %v565_v54, %v977_v38  ;;  %v579_v61 = vadd.s32 4294967256, %v980_v39 }
 0x1d5   :  { %v769_v0 = vpop.f32.mrb[12].mxu1  ;;  %v479_v10 = vsel %vm109_vm0, %v447_v5, 0.0  ;;  %v448_v12 = vmul.f32 %v929_v15, %v425_v2 }
 0x1d6   :  { %477 = vadd.xlane.f32.xlu0 %v476_v63  ;;  %v401_v1 = vpop.f32.mrb[13].mxu1  ;;  %v410_v4 = vadd.f32 %v769_v0, %v922_v9  ;;  %v575_v0 = vsub.s32 %v572_v57, %v977_v38 }
 0x1d7   :  { %v770_v6 = vpop.f32.mrb[14].mxu1  ;;  %v402_v11 = vadd.f32 %v922_v9, %v401_v1  ;;  %v482_v16 = vsel %vm109_vm0, %v448_v12, 0.0 }
 0x1d8   :  { %v404_v7 = vpop.f32.mrb[15].mxu1  ;;  %v430_v8 = vmax.f32 %v410_v4, 0.0  ;;  %v413_v19 = vadd.f32 %v770_v6, %v922_v9  ;;  %v582_v6 = vsub.s32 %v579_v61, %v977_v38 }
 0x1d9   :  { %v428_v14 = vmax.f32 %v402_v11, 0.0  ;;  %v405_v17 = vadd.f32 %v922_v9, %v404_v7  ;;  %v488_v9 = vsel %vm109_vm0, %v450_v62, 0.0 }
 0x1da   :  { %486 = vadd.xlane.f32.xlu0 %v485_v3  ;;  %v453_v18 = vmul.f32 %v929_v15, %v430_v8  ;;  %v431_v23 = vmax.f32 %v413_v19, 0.0  ;;  %v586_v3 = vadd.s32 4294967248, %v980_v39 }
 0x1db   :  { %v429_v20 = vmax.f32 %v405_v17, 0.0  ;;  %v451_v22 = vmul.f32 %v929_v15, %v428_v14  ;;  %v607_v17 = vadd.s32 4294967224, %v980_v39 }
 0x1dc   :  { %v497_v21 = vsel %vm109_vm0, %v453_v18, 0.0  ;;  %v454_v27 = vmul.f32 %v929_v15, %v431_v23  ;;  %v589_v8 = vsub.s32 %v586_v3, %v977_v38 }
 0x1dd   :  { %v491_v24 = vsel %vm109_vm0, %v451_v22, 0.0  ;;  %v452_v25 = vmul.f32 %v929_v15, %v429_v20  ;;  %v511_v15 = vsub.s32 0, %v977_v38 }
 0x1de   :  { %480 = vadd.xlane.f32.xlu0 %v479_v10  ;;  %v500_v28 = vsel %vm109_vm0, %v454_v27, 0.0  ;;  %v593_v10 = vadd.s32 4294967240, %v980_v39  ;;  %v614_v27 = vadd.s32 4294967216, %v980_v39 }
 0x1df   :  { %v494_v26 = vsel %vm109_vm0, %v452_v25, 0.0  ;;  %vm654_vm0 = vcmask 1048512  }
 0x1e0   :  { %v596_v19 = vsub.s32 %v593_v10, %v977_v38  ;;  %v617_v35 = vsub.s32 %v614_v27, %v977_v38 }
 0x1e1   :  { %506 = vperm.xlu1 %773, %v503_v13   ;;  %v600_v13 = vadd.s32 4294967232, %v980_v39 }
 0x1e2   :  { %483 = vadd.xlane.f32.xlu0 %v482_v16 }
 0x1e3   :  { %v603_v22 = vsub.s32 %v600_v13, %v977_v38 }
 0x1e6   :  { %498 = vadd.xlane.f32.xlu0 %v497_v21 }
 0x1ea   :  { %492 = vadd.xlane.f32.xlu0 %v491_v24  ;;  %v610_v24 = vsub.s32 %v607_v17, %v977_v38 }
 0x1ee   :  { %495 = vadd.xlane.f32.xlu0 %v494_v26 }
 0x1f2   :  { %501 = vadd.xlane.f32.xlu0 %v500_v28 }
 0x205   :  { %489 = vadd.xlane.f32.xlu1 %v488_v9 }
 0x252   :  { %v463_v32 = vpop.xlane.xlu1 %462 }
 0x253   :  { %v457_v29 = vpop.xlane.xlu0 %456 }
 0x256   :  { %v466_v34 = vpop.xlane.xlu1 %465 }
 0x257   :  { %v460_v30 = vpop.xlane.xlu0 %459 }
 0x25b   :  { %v475_v31 = vpop.xlane.xlu0 %474 }
 0x25d   :  { %v472_v36 = vpop.xlane.xlu1 %471 }
 0x25f   :  { %v469_v33 = vpop.xlane.xlu0 %468 }
 0x261   :  { %v507_v40 = vpop.permute.xlu1 %506 }
 0x262   :  { %v984_v42 = vrot.slane %v507_v40, %v511_v15  ;;  %v649_v15 = vadd.s32 4294967176, %v980_v39 }
 0x263   :  { %v478_v37 = vpop.xlane.xlu0 %477 }
 0x264   :  { %v513_v46 = vadd.f32 %v984_v42, %v457_v29  ;;  %v514_v47 = vadd.f32 %v984_v42, %v460_v30  ;;  %v515_v50 = vadd.f32 %v984_v42, %v463_v32  ;;  %v516_v58 = vadd.f32 %v984_v42, %v466_v34 }
 0x265   :  { %v517_v62 = vadd.f32 %v984_v42, %v469_v33  ;;  %v518_v4 = vadd.f32 %v984_v42, %v472_v36  ;;  %v519_v11 = vadd.f32 %v984_v42, %v475_v31  ;;  %v520_v20 = vadd.f32 %v984_v42, %v478_v37 }
 0x266   :  { %v550_v52 = vrot.slane %v513_v46, %v549_v48  ;;  %v555_v53 = vrot.slane %v514_v47, %v554_v49  ;;  %v562_v56 = vrot.slane %v515_v50, %v561_v51  ;;  %v569_v2 = vrot.slane %v516_v58, %v568_v60 }
 0x267   :  { %v982_v41 = vpop.xlane.xlu0 %486  ;;  %v576_v7 = vrot.slane %v517_v62, %v575_v0  ;;  %v583_v16 = vrot.slane %v518_v4, %v582_v6  ;;  %v590_v21 = vrot.slane %v519_v11, %v589_v8  ;;  %v597_v9 = vrot.slane %v520_v20, %v596_v19 }
 0x268   :  { %v557_v59 = vsel %vm556_vm2, %v555_v53, %v550_v52  ;;  %v621_v29 = vadd.s32 4294967208, %v980_v39  ;;  %v628_v31 = vadd.s32 4294967200, %v980_v39  ;;  %v635_v34 = vadd.s32 4294967192, %v980_v39 }
 0x269   :  { %v564_v63 = vsel %vm563_vm3, %v562_v56, %v557_v59  ;;  %v523_v36 = vadd.f32 %v984_v42, %v982_v41  ;;  %v642_v37 = vadd.s32 4294967184, %v980_v39  ;;  %v652_v53 = vsub.s32 %v649_v15, %v977_v38 }
 0x26a   :  { %v571_v5 = vsel %vm570_vm4, %v569_v2, %v564_v63  ;;  %v624_v40 = vsub.s32 %v621_v29, %v977_v38  ;;  %v631_v44 = vsub.s32 %v628_v31, %v977_v38  ;;  %v638_v49 = vsub.s32 %v635_v34, %v977_v38 }
 0x26b   :  { %v481_v45 = vpop.xlane.xlu0 %480  ;;  %v578_v12 = vsel %vm577_vm5, %v576_v7, %v571_v5  ;;  %v618_v51 = vrot.slane %v523_v36, %v617_v35  ;;  %v645_v39 = vsub.s32 %v642_v37, %v977_v38 }
 0x26c   :  { %v585_v18 = vsel %vm584_vm6, %v583_v16, %v578_v12  ;;  %v521_v23 = vadd.f32 %v984_v42, %v481_v45 }
 0x26d   :  { %v592_v26 = vsel %vm591_vm7, %v590_v21, %v585_v18 }
 0x26e   :  { %v604_v30 = vrot.slane %v521_v23, %v603_v22  ;;  %v599_v32 = vsel %vm598_vm8, %v597_v9, %v592_v26 }
 0x26f   :  { %v484_v55 = vpop.xlane.xlu0 %483 }
 0x270   :  { %v522_v25 = vadd.f32 %v984_v42, %v484_v55  ;;  %v606_v43 = vsel %vm605_vm9, %v604_v30, %v599_v32 }
 0x272   :  { %v611_v33 = vrot.slane %v522_v25, %v610_v24 }
 0x273   :  { %v499_v1 = vpop.xlane.xlu0 %498 }
 0x274   :  { %v613_v48 = vsel %vm612_vm10, %v611_v33, %v606_v43  ;;  %v527_v52 = vadd.f32 %v984_v42, %v499_v1 }
 0x275   :  { %v620_v57 = vsel %vm619_vm11, %v618_v51, %v613_v48 }
 0x276   :  { %v646_v60 = vrot.slane %v527_v52, %v645_v39 }
 0x277   :  { %v493_v14 = vpop.xlane.xlu0 %492 }
 0x278   :  { %v525_v45 = vadd.f32 %v984_v42, %v493_v14 }
 0x27a   :  { %v632_v56 = vrot.slane %v525_v45, %v631_v44 }
 0x27b   :  { %v496_v28 = vpop.xlane.xlu0 %495 }
 0x27c   :  { %v526_v41 = vadd.f32 %v984_v42, %v496_v28 }
 0x27e   :  { %v639_v58 = vrot.slane %v526_v41, %v638_v49 }
 0x27f   :  { %v502_v46 = vpop.xlane.xlu0 %501 }
 0x280   :  { %v528_v54 = vadd.f32 %v984_v42, %v502_v46 }
 0x282   :  { %v653_v62 = vrot.slane %v528_v54, %v652_v53 }
 0x292   :  { %v490_v47 = vpop.xlane.xlu1 %489 }
 0x293   :  { %v524_v50 = vadd.f32 %v984_v42, %v490_v47 }
 0x295   :  { %v625_v55 = vrot.slane %v524_v50, %v624_v40 }
 0x297   :  { %v627_v59 = vsel %vm626_vm12, %v625_v55, %v620_v57 }
 0x298   :  { %v634_v61 = vsel %vm633_vm13, %v632_v56, %v627_v59 }
 0x299   :  { %v641_v63 = vsel %vm640_vm14, %v639_v58, %v634_v61 }
 0x29a   :  { %v648_v0 = vsel %vm647_vm15, %v646_v60, %v641_v63 }
 0x29b   :  { %v655_v38 = vsel %vm654_vm0, %v653_v62, %v648_v0 }
 0x29c   :  { %657 = vst [vmem:[#allocation3] sm:$0x1] %v655_v38 }
 0x29d   :  { %800 = shalt.err (!%p797_p4)
}
 0x29e   :  { %s801_s1 = scalar_lea.hbm %s1054_s7, 16 }
 0x29f   :  { %p802_p5 = scmp.ne.s32.totalorder %s1054_s7, %s801_s1  ;;  %p805_p6 = scmp.lt.u32.totalorder %s801_s1, %s1054_s7 }
 0x2a1   :  { %p807_p7 = pnand %p805_p6, %p802_p5 }
 0x2a3   :  { %810 = shalt.err (!%p807_p7)
}
 0x2a4   :  { %667 = dma.vmem_to_hbm [thread:$0]  %s665_s5, 16, %s1054_s7, [#allocation4]  }
 0x2a5   :  { %811 = dma.done.wait [#allocation4], 16  }
 0x2a6   :  { %812 = vsyncadd [#allocation4], 4294967280 }
 0x2a7   :  { %671 = vsyncpa [#allocation4], 1 }

</bundles_post_ra>
